<compile_context>
chip_gen: v6e
topology: v6e:2x2x1
jax: 0.10.0
libtpu: 0.0.40
codegen_flags: <defaults>
</compile_context>

<pallas_src>
import functools

import jax
import jax.numpy as jnp
from jax import lax
from jax.experimental import pallas as pl
from jax.experimental.pallas import tpu as pltpu


def _round_up(x: int, m: int) -> int:
    return ((x + m - 1) // m) * m


def _tpu_vmem_and_cores():
    """Best-effort (vmem_capacity_bytes, tensorcores_per_device)."""
    vmem_cap = 64 << 20          # conservative default = v7x per-TensorCore VMEM
    cores = 1
    try:
        info = pltpu.get_tpu_info()
        vmem_cap = int(getattr(info, "vmem_capacity_bytes", vmem_cap))
    except Exception:
        pass
    try:
        kind = jax.devices()[0].device_kind.lower()
        # Two TensorCores per Pallas device: v4/v5p megacore and v7x.
        if ("v4" in kind) or ("v5p" in kind) or ("7" in kind):
            cores = 2
    except Exception:
        pass
    return vmem_cap, cores


def _mse_loss_kernel(x_ref, out_ref, acc_ref, *, steps, tile_rows, chunk,
                     period, total_rows, full_tiles, need_mask):
    c = pl.program_id(0)                 # "parallel" (core) axis
    i = pl.program_id(1)                 # "arbitrary" (reduction) axis
    tile = c * steps + i                 # global tile index (unclamped)
    w = x_ref.shape[1]

    @pl.when(i == 0)
    def _init():
        acc_ref[...] = jnp.zeros_like(acc_ref)

    # Constant target row: -1 at "positive" lanes (lane % period == 0), else 0.
    lane = lax.broadcasted_iota(jnp.int32, (1, w), 1)
    tgt = jnp.where(lane % period == 0, jnp.float32(-1.0), jnp.float32(0.0))

    def accumulate(masked):
        n_inner = tile_rows // chunk

        def body(j, carry):
            r0 = j * chunk
            if not isinstance(r0, int):
                r0 = pl.multiple_of(r0, chunk)
            x = x_ref[pl.ds(r0, chunk), :].astype(jnp.float32)
            s = x + tgt                                  # x - target, fused
            if masked:
                row = (tile * tile_rows + r0
                       + lax.broadcasted_iota(jnp.int32, (chunk, 1), 0))
                s = jnp.where(row < total_rows, s, 0.0)  # zero invalid rows
            # Fold `chunk` rows down to 8 sublanes with element-wise VPU adds.
            acc_ref[...] += jnp.sum((s * s).reshape(chunk // 8, 8, w), axis=0)
            return carry

        if n_inner == 1:
            body(0, 0)
        else:
            lax.fori_loop(0, n_inner, body, 0)

    if need_mask:
        is_partial = tile >= full_tiles

        @pl.when(jnp.logical_not(is_partial))
        def _full():
            accumulate(False)

        @pl.when(is_partial)
        def _partial():
            accumulate(True)
    else:
        accumulate(False)

    @pl.when(i == steps - 1)
    def _finalize():
        partial = jnp.sum(acc_ref[...])   # single cross-lane reduction per core
        out_ref[...] = jnp.full(out_ref.shape, partial, dtype=out_ref.dtype)


def mse_loss(y_pred: jax.Array, y_true: jax.Array | None = None, *,
             tile_rows: int | None = None, cores: int | None = None) -> jax.Array:
    """Pallas implementation of MSELoss.forward (y_true accepted but unused,
    matching the reference module)."""
    assert y_pred.ndim == 2, "expected (batch, 1 + num_negs)"
    b, n = y_pred.shape
    itemsize = jnp.dtype(y_pred.dtype).itemsize
    sub = max(8, 32 // itemsize)          # sublane multiple for this dtype

    vmem_cap, auto_cores = _tpu_vmem_and_cores()
    if cores is None:
        cores = auto_cores
    cores = max(1, min(2, int(cores)))

    # Lane-dense repack for narrow rows: a free, contiguous row-major reshape.
    # The positive column becomes every (lane % n == 0) lane of the 128-wide slab.
    if n < 128 and 128 % n == 0 and (b * n) % 128 == 0 and b * n >= 128:
        work = y_pred.reshape((b * n) // 128, 128)
    else:
        work = y_pred
    rows, w = work.shape
    w_pad = _round_up(w, 128)
    period = n                            # lane period of "positive" entries

    # Rows per inner fori_loop chunk: ~256 KiB of f32 values, keeps in-kernel
    # temporaries bounded independent of the (large) DMA block size.
    chunk = max(sub, ((1 << 16) // w_pad) // sub * sub)

    if tile_rows is None:
        # ~8 MiB per input block (double-buffered): amortizes the ~0.35 us
        # per-grid-step overhead to a few percent of the DMA time even on
        # v7x HBM, while 2 blocks + scratch stay well below 64 MiB VMEM.
        target_bytes = 8 << 20
        tile_rows = max(chunk, target_bytes // max(1, w_pad * itemsize))
    tile_rows = max(sub, (int(tile_rows) // sub) * sub)
    tile_rows = min(tile_rows, _round_up(rows, sub))    # don't exceed the input
    if tile_rows >= chunk:
        tile_rows = (tile_rows // chunk) * chunk        # whole number of chunks
    else:
        chunk = tile_rows

    nblocks = pl.cdiv(rows, tile_rows)                  # blocks that touch data
    cores = min(cores, nblocks)
    steps = pl.cdiv(nblocks, cores)
    total_tiles = cores * steps
    full_tiles = rows // tile_rows                      # fully-valid blocks
    need_mask = total_tiles * tile_rows > rows

    if total_tiles > nblocks:
        # Tiles past the end (only possible with cores=2 and an odd block
        # count) are clamped back onto the last real block; their contribution
        # is fully masked out in-kernel.
        def in_index_map(ci, ii):
            return (jnp.minimum(ci * steps + ii, nblocks - 1), 0)
    else:
        def in_index_map(ci, ii):
            return (ci * steps + ii, 0)

    kernel = functools.partial(
        _mse_loss_kernel, steps=steps, tile_rows=tile_rows, chunk=chunk,
        period=period, total_rows=rows, full_tiles=full_tiles,
        need_mask=need_mask)

    # Accurate (lane-padded) VMEM accounting: double-buffered input block, the
    # (8, w) accumulator, the output block and ~4x chunk-of-f32 temporaries.
    needed = (2 * tile_rows * w_pad * itemsize
              + 8 * w_pad * 4
              + 2 * 8 * 128 * 4
              + 4 * chunk * w_pad * 4)
    vmem_budget = max(vmem_cap - (8 << 20), 16 << 20)   # Mosaic scratch headroom
    vmem_limit = int(min(max(needed + (4 << 20), 16 << 20), vmem_budget))

    grid_spec = pltpu.PrefetchScalarGridSpec(
        num_scalar_prefetch=0,
        grid=(cores, steps),
        in_specs=[pl.BlockSpec((tile_rows, w), in_index_map)],
        # One lane-dense (1, 8, 128) partial block per core.
        out_specs=pl.BlockSpec((1, 8, 128), lambda ci, ii: (ci, 0, 0)),
        scratch_shapes=[pltpu.VMEM((8, w), jnp.float32)],   # sum((x-t)^2) acc
    )

    partials = pl.pallas_call(
        kernel,
        out_shape=jax.ShapeDtypeStruct((cores, 8, 128), jnp.float32),
        grid_spec=grid_spec,
        compiler_params=pltpu.CompilerParams(
            dimension_semantics=("parallel", "arbitrary"),
            vmem_limit_bytes=vmem_limit,
        ),
        cost_estimate=pl.CostEstimate(
            flops=3 * total_tiles * tile_rows * w,
            transcendentals=0,
            bytes_accessed=rows * w * itemsize + cores * 8 * 128 * 4,
        ),
    )(work)

    total = jnp.sum(partials[:, 0, 0])
    # total == sum over the true batch of (y_pred - target)^2 (padding masked).
    return total / (2.0 * b)


def _reference(y_pred: jax.Array) -> jax.Array:
    pos = y_pred[:, 0].astype(jnp.float32)
    neg = y_pred[:, 1:].astype(jnp.float32)
    pos_loss = (pos - 1.0) ** 2 / 2.0
    neg_loss = jnp.sum(neg**2, axis=-1) / 2.0
    return jnp.mean(pos_loss + neg_loss)


if __name__ == "__main__":
    key = jax.random.PRNGKey(0)
    ks = jax.random.split(key, 5)

    # Primary example: y_pred (batch=8, 1 + num_negs=32); y_true passed for parity.
    batch, num_negs = 8, 31
    y_pred = jax.random.normal(ks[0], (batch, 1 + num_negs), dtype=jnp.float32)
    y_true = jnp.concatenate(
        [jnp.ones((batch, 1), jnp.float32), jnp.zeros((batch, num_negs), jnp.float32)],
        axis=1,
    )
    out = jax.block_until_ready(mse_loss(y_pred, y_true))
    ref = jax.block_until_ready(_reference(y_pred))
    assert jnp.allclose(out, ref, rtol=1e-4, atol=1e-4), (out, ref)

    # Multi-tile + explicit 2-"core" grid with an ODD tile count: exercises the
    # clamped index_map, in-kernel remainder masking and per-core partials.
    y2 = jax.random.normal(ks[1], (300, 128), dtype=jnp.float32)
    out2 = jax.block_until_ready(mse_loss(y2, None, tile_rows=64, cores=2))
    ref2 = jax.block_until_ready(_reference(y2))
    assert jnp.allclose(out2, ref2, rtol=1e-3, atol=1e-3), (out2, ref2)

    # bf16 stays bf16 through the DMA; lane-dense repack path (n=16 divides 128).
    y3 = jax.random.normal(ks[2], (40, 16), dtype=jnp.float32).astype(jnp.bfloat16)
    out3 = jax.block_until_ready(mse_loss(y3))
    ref3 = jax.block_until_ready(_reference(y3))
    assert jnp.allclose(out3, ref3, rtol=1e-3, atol=1e-3), (out3, ref3)

    # Odd row width (no repack, lane-padded block) + remainder-row masking.
    y4 = jax.random.normal(ks[3], (5, 33), dtype=jnp.float32)
    out4 = jax.block_until_ready(mse_loss(y4))
    ref4 = jax.block_until_ready(_reference(y4))
    assert jnp.allclose(out4, ref4, rtol=1e-4, atol=1e-4), (out4, ref4)

    # Large-block path: multiple inner fori_loop chunks per DMA block plus a
    # masked final tile (1536 rows, tile_rows=1024 -> 2 x 512-row chunks).
    y5 = jax.random.normal(ks[4], (1536, 128), dtype=jnp.float32)
    out5 = jax.block_until_ready(mse_loss(y5, None, tile_rows=1024, cores=1))
    ref5 = jax.block_until_ready(_reference(y5))
    assert jnp.allclose(out5, ref5, rtol=1e-3, atol=1e-3), (out5, ref5)

    print("KERNEL_OK")
</pallas_src>

<mosaic_0001>
module attributes {stable_mosaic.version = 11 : i64} {
  func.func @_mse_loss_kernel(%arg0: i32, %arg1: i32, %arg2: memref<8x128xf32, #tpu.memory_space<vmem>>, %arg3: memref<1x8x128xf32, #tpu.memory_space<vmem>>, %arg4: memref<8x128xf32, #tpu.memory_space<vmem>>) attributes {dimension_semantics = [#tpu.dimension_semantics<parallel>, #tpu.dimension_semantics<arbitrary>], iteration_bounds = array<i64: 1, 1>, scalar_prefetch = 0 : i64, scratch_operands = 1 : i64, tpu.core_type = #tpu.core_type<tc>, window_params = [{transform_indices = @transform_0, window_bounds = array<i64: 8, 128>}, {transform_indices = @transform_1, window_bounds = array<i64: 1, 8, 128>}]} {
    %c1_i32 = arith.constant 1 : i32
    %0 = arith.muli %arg0, %c1_i32 : i32
    %1 = arith.addi %0, %arg1 : i32
    %c0_i32 = arith.constant 0 : i32
    %2 = arith.cmpi eq, %arg1, %c0_i32 : i32
    %3 = arith.extui %2 : i1 to i32
    %c0_i32_0 = arith.constant 0 : i32
    %4 = arith.cmpi ne, %3, %c0_i32_0 : i32
    scf.if %4 {
      %cst_13 = arith.constant 0.000000e+00 : f32
      %36 = vector.broadcast %cst_13 : f32 to vector<8x128xf32>
      %c0 = arith.constant 0 : index
      %c0_14 = arith.constant 0 : index
      %37 = vector.load %arg4[%c0, %c0_14] : memref<8x128xf32, #tpu.memory_space<vmem>>, vector<8x128xf32>
      tpu.vector_store %arg4[%c0, %c0_14], %36 {strides = array<i32>} : memref<8x128xf32, #tpu.memory_space<vmem>>, vector<8x128xf32>,
    } else {
    }
    %5 = tpu.iota {dimensions = array<i32: 1>} : vector<1x128xi32>
    %c32_i32 = arith.constant 32 : i32
    %c0_i32_1 = arith.constant 0 : i32
    %6 = arith.cmpi eq, %c32_i32, %c0_i32_1 : i32
    %c1_i32_2 = arith.constant 1 : i32
    %7 = arith.select %6, %c1_i32_2, %c32_i32 : i32
    %8 = vector.broadcast %7 : i32 to vector<1x128xi32>
    %9 = arith.remsi %5, %8 : vector<1x128xi32>
    %c0_i32_3 = arith.constant 0 : i32
    %10 = vector.broadcast %c0_i32_3 : i32 to vector<1x128xi32>
    %11 = arith.cmpi ne, %9, %10 : vector<1x128xi32>
    %c0_i32_4 = arith.constant 0 : i32
    %12 = vector.broadcast %c0_i32_4 : i32 to vector<1x128xi32>
    %13 = arith.cmpi slt, %9, %12 : vector<1x128xi32>
    %c0_i32_5 = arith.constant 0 : i32
    %14 = arith.cmpi slt, %7, %c0_i32_5 : i32
    %15 = vector.broadcast %14 : i1 to vector<1x128xi1>
    %16 = vector.broadcast %15 : vector<1x128xi1> to vector<1x128xi1>
    %17 = arith.xori %13, %16 : vector<1x128xi1>
    %18 = arith.andi %17, %11 : vector<1x128xi1>
    %19 = vector.broadcast %7 : i32 to vector<1x128xi32>
    %20 = arith.addi %9, %19 : vector<1x128xi32>
    %21 = arith.select %18, %20, %9 : vector<1x128xi1>, vector<1x128xi32>
    %c0_i32_6 = arith.constant 0 : i32
    %22 = vector.broadcast %c0_i32_6 : i32 to vector<1x128xi32>
    %23 = arith.cmpi eq, %21, %22 : vector<1x128xi32>
    %cst = arith.constant -1.000000e+00 : f32
    %cst_7 = arith.constant 0.000000e+00 : f32
    %24 = vector.broadcast %cst : f32 to vector<1x128xf32>
    %25 = vector.broadcast %cst_7 : f32 to vector<1x128xf32>
    %26 = arith.select %23, %24, %25 : vector<1x128xi1>, vector<1x128xf32>
    %c0_i32_8 = arith.constant 0 : i32
    %27 = arith.cmpi sge, %1, %c0_i32_8 : i32
    %true = arith.constant true
    %28 = arith.xori %27, %true : i1
    %29 = arith.extui %28 : i1 to i32
    %c0_i32_9 = arith.constant 0 : i32
    %30 = arith.cmpi ne, %29, %c0_i32_9 : i32
    scf.if %30 {
      %c0 = arith.constant 0 : index
      %c0_13 = arith.constant 0 : index
      %36 = vector.load %arg2[%c0, %c0_13] : memref<8x128xf32, #tpu.memory_space<vmem>>, vector<8x128xf32>
      %37 = vector.broadcast %26 : vector<1x128xf32> to vector<8x128xf32>
      %38 = arith.addf %36, %37 : vector<8x128xf32>
      %c0_14 = arith.constant 0 : index
      %c0_15 = arith.constant 0 : index
      %39 = vector.load %arg4[%c0_14, %c0_15] : memref<8x128xf32, #tpu.memory_space<vmem>>, vector<8x128xf32>
      %40 = arith.mulf %38, %38 : vector<8x128xf32>
      %41 = vector.shape_cast %40 : vector<8x128xf32> to vector<1x8x128xf32>
      %cst_16 = arith.constant dense<0.000000e+00> : vector<8x128xf32>
      %42 = vector.multi_reduction <add>, %41, %cst_16 [0] : vector<1x8x128xf32> to vector<8x128xf32>
      %43 = arith.addf %39, %42 : vector<8x128xf32>
      %c0_17 = arith.constant 0 : index
      %c0_18 = arith.constant 0 : index
      %44 = vector.load %arg4[%c0_17, %c0_18] : memref<8x128xf32, #tpu.memory_space<vmem>>, vector<8x128xf32>
      tpu.vector_store %arg4[%c0_17, %c0_18], %43 {strides = array<i32>} : memref<8x128xf32, #tpu.memory_space<vmem>>, vector<8x128xf32>,
    } else {
    }
    %31 = arith.extui %27 : i1 to i32
    %c0_i32_10 = arith.constant 0 : i32
    %32 = arith.cmpi ne, %31, %c0_i32_10 : i32
    scf.if %32 {
      %c0 = arith.constant 0 : index
      %c0_13 = arith.constant 0 : index
      %36 = vector.load %arg2[%c0, %c0_13] : memref<8x128xf32, #tpu.memory_space<vmem>>, vector<8x128xf32>
      %37 = vector.broadcast %26 : vector<1x128xf32> to vector<8x128xf32>
      %38 = arith.addf %36, %37 : vector<8x128xf32>
      %c8_i32 = arith.constant 8 : i32
      %39 = arith.muli %1, %c8_i32 : i32
      %c0_i32_14 = arith.constant 0 : i32
      %40 = arith.addi %39, %c0_i32_14 : i32
      %41 = tpu.iota {dimensions = array<i32: 0>} : vector<8x1xi32>
      %42 = vector.broadcast %40 : i32 to vector<8x1xi32>
      %43 = arith.addi %42, %41 : vector<8x1xi32>
      %c2_i32 = arith.constant 2 : i32
      %44 = vector.broadcast %c2_i32 : i32 to vector<8x1xi32>
      %45 = arith.cmpi slt, %43, %44 : vector<8x1xi32>
      %cst_15 = arith.constant 0.000000e+00 : f32
      %46 = vector.shape_cast %45 : vector<8x1xi1> to vector<8x1xi1>
      %47 = vector.broadcast %46 : vector<8x1xi1> to vector<8x128xi1>
      %48 = vector.broadcast %cst_15 : f32 to vector<8x128xf32>
      %49 = arith.select %47, %38, %48 : vector<8x128xi1>, vector<8x128xf32>
      %c0_16 = arith.constant 0 : index
      %c0_17 = arith.constant 0 : index
      %50 = vector.load %arg4[%c0_16, %c0_17] : memref<8x128xf32, #tpu.memory_space<vmem>>, vector<8x128xf32>
      %51 = arith.mulf %49, %49 : vector<8x128xf32>
      %52 = vector.shape_cast %51 : vector<8x128xf32> to vector<1x8x128xf32>
      %cst_18 = arith.constant dense<0.000000e+00> : vector<8x128xf32>
      %53 = vector.multi_reduction <add>, %52, %cst_18 [0] : vector<1x8x128xf32> to vector<8x128xf32>
      %54 = arith.addf %50, %53 : vector<8x128xf32>
      %c0_19 = arith.constant 0 : index
      %c0_20 = arith.constant 0 : index
      %55 = vector.load %arg4[%c0_19, %c0_20] : memref<8x128xf32, #tpu.memory_space<vmem>>, vector<8x128xf32>
      tpu.vector_store %arg4[%c0_19, %c0_20], %54 {strides = array<i32>} : memref<8x128xf32, #tpu.memory_space<vmem>>, vector<8x128xf32>,
    } else {
    }
    %c0_i32_11 = arith.constant 0 : i32
    %33 = arith.cmpi eq, %arg1, %c0_i32_11 : i32
    %34 = arith.extui %33 : i1 to i32
    %c0_i32_12 = arith.constant 0 : i32
    %35 = arith.cmpi ne, %34, %c0_i32_12 : i32
    scf.if %35 {
      %c0 = arith.constant 0 : index
      %c0_13 = arith.constant 0 : index
      %36 = vector.load %arg4[%c0, %c0_13] : memref<8x128xf32, #tpu.memory_space<vmem>>, vector<8x128xf32>
      %37 = vector.shape_cast %36 : vector<8x128xf32> to vector<1x8x128xf32>
      %cst_14 = arith.constant dense<0.000000e+00> : vector<1xf32>
      %38 = vector.multi_reduction <add>, %37, %cst_14 [1, 2] : vector<1x8x128xf32> to vector<1xf32>
      %39 = vector.shape_cast %38 : vector<1xf32> to vector<1x1x1xf32>
      %40 = vector.extract %39[0, 0, 0] : f32 from vector<1x1x1xf32>
      %41 = vector.broadcast %40 : f32 to vector<1x8x128xf32>
      %c0_15 = arith.constant 0 : index
      %c0_16 = arith.constant 0 : index
      %c0_17 = arith.constant 0 : index
      %42 = vector.load %arg3[%c0_15, %c0_16, %c0_17] : memref<1x8x128xf32, #tpu.memory_space<vmem>>, vector<1x8x128xf32>
      tpu.vector_store %arg3[%c0_15, %c0_16, %c0_17], %41 {strides = array<i32>} : memref<1x8x128xf32, #tpu.memory_space<vmem>>, vector<1x8x128xf32>,
    } else {
    }
    return
  }
  func.func @transform_0(%arg0: i32, %arg1: i32) -> (i32, i32) {
    %c1_i32 = arith.constant 1 : i32
    %0 = arith.muli %arg0, %c1_i32 : i32
    %1 = arith.addi %0, %arg1 : i32
    %c0_i32 = arith.constant 0 : i32
    %c0_i32_0 = arith.constant 0 : i32
    return %1, %c0_i32 : i32, i32
  }
  func.func @transform_1(%arg0: i32, %arg1: i32) -> (i32, i32, i32) {
    %c0_i32 = arith.constant 0 : i32
    %c0_i32_0 = arith.constant 0 : i32
    %c0_i32_1 = arith.constant 0 : i32
    return %arg0, %c0_i32, %c0_i32_0 : i32, i32, i32
  }
}

</mosaic_0001>

<bundles_post_ra>
// kernel: tpu_custom_call.1
= control target key start
LH: loop header
LB: loop body
LE: loop exit
PB: predicated region body
PF: predicated region fallthrough
CT: control target
= control target key end

     0   :  { %6 = vsyncpa [#allocation4], 0  ;;  %s190_s0 = inlined_call_operand.hbm [shape: f32[2,128], index: 0, kind: input, shape index: {}]   ;;  %s191_s1 = inlined_call_operand.hbm [shape: f32[1,8,128], index: 1, kind: output, shape index: {}]  }
   0x1   :  { %7 = vsyncpa [#allocation5], 0 }
   0x2   :  { %16 = vsyncadd [#allocation4], 96  ;;  %s169_s6 = smov [#allocation3]  }
   0x3   :  { %s21_s7 = sshll.u32 %s169_s6, 4  ;;  %s22_s7 = int_to_ptr.vmem [resolvable:$true] %s21_s7 }
   0x4   :  { %s133_s8 = scalar_lea.vmem %s22_s7, 32  ;;  %s137_s9 = scalar_lea.vmem %s22_s7, 128 }
   0x5   :  { %p134_p0 = scmp.ne.s32.totalorder %s22_s7, %s133_s8  ;;  %p138_p1 = scmp.lt.s32.totalorder %s22_s7, %s22_s7 }
   0x6   :  { %p139_p2 = scmp.lt.s32.totalorder %s137_s9, %s133_s8 }
   0x8   :  { %p140_p3 = por %p139_p2, %p138_p1 }
   0xa   :  { %p141_p4 = pnand %p140_p3, %p134_p0 }
   0xc   :  { %144 = shalt.err (!%p141_p4)
}
   0xd   :  { %s170_s10 = smov 32   ;;  %s171_s11 = smov 2  }
   0xe   :  { %27 = dma.hbm_to_vmem [thread:$0]  %s190_s0, 32, %s22_s7, [#allocation4], %s170_s10, %s170_s10, %s171_s11  }
   0xf   :  { %165 = dma.done.wait [#allocation4], 128  }
  0x10   :  { %166 = vsyncadd [#allocation4], 4294967168  ;;  %v41_v0 = vlaneseq  ;;  %v172_v4 = vmov 0.0   ;;  %v72_v6 = vld [vmem:[#allocation3] sm:$0xff]  ;;  %s173_s0 = smov [#allocation6]  }
  0x11   :  { %s109_s14 = sshll.u32 %s173_s0, 4  ;;  %s110_s14 = int_to_ptr.vmem [resolvable:$true] %s109_s14 }
  0x12   :  { %v42_v1 = vand.u32 127, %v41_v0  ;;  %v76_v2 = vshrl.u32 %v41_v0, 7  ;;  %s145_s16 = scalar_lea.vmem %s110_s14, 128  ;;  %p150_p6 = scmp.lt.s32.totalorder %s110_s14, %s110_s14 }
  0x13   :  { %p146_p5 = scmp.ne.s32.totalorder %s110_s14, %s145_s16  ;;  %p151_p7 = scmp.lt.s32.totalorder %s145_s16, %s145_s16 }
  0x14   :  { %v47_v3 = vand.u32 31, %v42_v1  ;;  %vm79_vm1 = vcmp.lt.s32.totalorder %v76_v2, 2 }
  0x15   :  { %p152_p8 = por %p151_p7, %p150_p6 }
  0x16   :  { %vm55_vm0 = vcmp.eq.s32.totalorder %v47_v3, 0 }
  0x17   :  { %v56_v5 = vsel %vm55_vm0, -1.0, %v172_v4  ;;  %p153_p9 = pnand %p152_p8, %p146_p5 }
  0x18   :  { %v73_v7 = vadd.f32 %v72_v6, %v56_v5 }
  0x1a   :  { %v82_v8 = vsel %vm79_vm1, %v73_v7, 0.0 }
  0x1b   :  { %v84_v9 = vmul.f32 %v82_v8, %v82_v8 }
  0x1d   :  { %92 = vadd.xlane.f32.xlu0 %v84_v9 }
  0xa6   :  { %v93_v10 = vpop.xlane.xlu0 %92 }
  0xa7   :  { %v94_v11 = vrot.slane %v93_v10, 4 }
  0xa9   :  { %v95_v12 = vadd.f32 %v94_v11, %v93_v10 }
  0xab   :  { %v96_v13 = vrot.slane %v95_v12, 2 }
  0xad   :  { %v97_v14 = vadd.f32 %v96_v13, %v95_v12 }
  0xaf   :  { %v98_v15 = vrot.slane %v97_v14, 1 }
  0xb1   :  { %v99_v16 = vadd.f32 %v98_v15, %v97_v14 }
  0xb3   :  { %118 = vpush %v99_v16 }
  0xe4   :  { %s119_s15 = spop %118 }
  0xe5   :  { %v101_v17 = vstv %s119_s15 }
  0xe6   :  { %102 = vst [vmem:[#allocation6] sm:$0xff] %v101_v17 }
  0xe7   :  { %156 = shalt.err (!%p153_p9)
}
  0xe8   :  { %112 = dma.vmem_to_hbm [thread:$0]  %s110_s14, 128, %s191_s1, [#allocation5]  }
  0xe9   :  { %167 = dma.done.wait [#allocation5], 128  }
  0xea   :  { %168 = vsyncadd [#allocation5], 4294967168 }
  0xeb   :  { %116 = vsyncpa [#allocation4], 1 }
  0xec   :  { %117 = vsyncpa [#allocation5], 1 }

</bundles_post_ra>
